<compile_context>
chip_gen: v6e
topology: v6e:2x2x1
jax: 0.10.0
libtpu: 0.0.40
codegen_flags: <defaults>
</compile_context>

<pallas_src>
import functools

import jax
import jax.numpy as jnp
from jax.experimental import pallas as pl
from jax.experimental.pallas import tpu as pltpu


def autopad(k, p=None, d=1):
    if d > 1:
        k = d * (k - 1) + 1 if isinstance(k, int) else [d * (x - 1) + 1 for x in k]
    if p is None:
        p = k // 2 if isinstance(k, int) else [x // 2 for x in k]
    return p


def _cdiv(a, b):
    return -(-a // b)


def _conv_ln_relu_kernel(x_hbm, w_ref, gamma_ref, beta_ref, o_ref, xbuf, sems,
                         *, K, d, c2):
    # x_hbm:     (B, L_pad + 2*pad, C1p) zero-padded input, left in HBM (pl.ANY)
    # w_ref:     (K*C1p, C2p)            im2col-folded conv weight (lane-padded)
    # gamma_ref: (1, C2p)                LayerNorm weight (zero-padded)
    # beta_ref:  (1, C2p)                LayerNorm bias   (zero-padded)
    # o_ref:     (TL, C2p)               output tile for (batch b, seq tile j)
    # xbuf:      (2, W, C1p)             double-buffered halo'd input windows
    # sems:      (2,)                    DMA semaphores (one per buffer slot)
    b = pl.program_id(0)
    j = pl.program_id(1)
    n_l = pl.num_programs(1)
    TL = o_ref.shape[0]
    W = xbuf.shape[1]

    slot = j % 2

    def window_copy(jj, sl):
        start = pl.multiple_of(jj * TL, TL)
        return pltpu.make_async_copy(x_hbm.at[b, pl.ds(start, W), :],
                                     xbuf.at[sl], sems.at[sl])

    # Prime the chain at the first sequence tile of this batch element.  The
    # j-axis is "arbitrary", so all tiles of one b run in-order on one core.
    @pl.when(j == 0)
    def _():
        window_copy(0, 0).start()

    # Prefetch the next tile's window behind this tile's compute.
    @pl.when(j + 1 < n_l)
    def _():
        window_copy(j + 1, 1 - slot).start()

    # Wait for the current window (started either above at j==0 or during the
    # previous step).  Same static shape => same byte count for the wait.
    window_copy(j, slot).wait()

    # ---- Conv1d (stride=1, bias=False) as a single im2col matmul ----
    # Output row i uses window rows i + t*d, t in [0, K).  C1p is a multiple of
    # 128, so the concat boundaries are lane-tile aligned (no relayout).
    if K == 1:
        slab = xbuf[slot, pl.ds(0, TL), :]
    else:
        slab = jnp.concatenate(
            [xbuf[slot, pl.ds(t * d, TL), :] for t in range(K)], axis=-1)
    acc = jnp.dot(slab, w_ref[...], preferred_element_type=jnp.float32)

    # ---- LayerNorm over the real C2 channels (single-pass stats) + ReLU ----
    # Padded output channels have zero weights/gamma/beta, so they contribute
    # nothing to the sums and come out exactly zero.
    inv_c = 1.0 / c2
    mean = jnp.sum(acc, axis=-1, keepdims=True) * inv_c
    ex2 = jnp.sum(acc * acc, axis=-1, keepdims=True) * inv_c
    var = jnp.maximum(ex2 - mean * mean, 0.0)
    xhat = (acc - mean) * jax.lax.rsqrt(var + 1e-5)   # eps matches torch default
    y = xhat * gamma_ref[...] + beta_ref[...]
    o_ref[...] = jnp.maximum(y, 0.0).astype(o_ref.dtype)


def conv1d_block(x, weight_oik, gamma, beta, *, k, s=1, p=None, d=1,
                 tl=None, out_dtype=None):
    """x: (B, L, C1) channels-last; weight_oik: (C2, C1, K) torch Conv1d layout."""
    B, L, C1 = x.shape
    C2, C1w, K = weight_oik.shape
    assert C1w == C1 and K == k
    assert s == 1, "module defaults use stride=1"
    pad = autopad(k, p, d)
    halo = d * (K - 1)
    # 'same' convolution (odd effective kernel + default autopad) -> L_out == L.
    assert halo == 2 * pad, "kernel supports the default 'same' padding (odd k)"

    # Lane-pad channels to multiples of 128: dense output stores, lane-aligned
    # im2col concat, and >=512 B contiguous DMA rows for the input window.
    C1p = _cdiv(C1, 128) * 128
    C2p = _cdiv(C2, 128) * 128

    # Sequence tile: f32 accumulator (TL, C2p) budgeted at ~512 KiB, TL a
    # multiple of 8.  L is padded up to n_l * TL so every tile is full (the
    # extra rows are finite garbage and sliced off below).
    if tl is None:
        tl_cap = max(8, min(512, (512 * 1024) // (4 * C2p)))
        n_l = _cdiv(L, tl_cap)
        tl = _cdiv(_cdiv(L, n_l), 8) * 8
    else:
        tl = _cdiv(tl, 8) * 8
        n_l = _cdiv(L, tl)
    L_pad = n_l * tl
    W = tl + halo
    out_dtype = out_dtype or x.dtype

    # Zero-pad x: halo rows on both ends of L, ragged-L fill, lane-pad C1.
    xp = jnp.pad(x, ((0, 0), (pad, pad + L_pad - L), (0, C1p - C1)))

    # Conv weight -> im2col layout (K*C1p, C2p); padded rows/cols are zero.
    w = jnp.transpose(weight_oik, (2, 1, 0))                       # (K, C1, C2)
    w = jnp.pad(w, ((0, 0), (0, C1p - C1), (0, C2p - C2)))         # (K, C1p, C2p)
    w2 = w.reshape(K * C1p, C2p).astype(x.dtype)
    gamma2 = jnp.pad(gamma.astype(jnp.float32).reshape(1, C2), ((0, 0), (0, C2p - C2)))
    beta2 = jnp.pad(beta.astype(jnp.float32).reshape(1, C2), ((0, 0), (0, C2p - C2)))

    # VMEM budget derived from the actual footprint (+ slack), clamped for v7x.
    xbytes = jnp.dtype(x.dtype).itemsize
    obytes = jnp.dtype(out_dtype).itemsize
    est = (2 * K * C1p * C2p * xbytes          # resident weights (double-buffered)
           + 2 * tl * C2p * obytes             # output tile (double-buffered)
           + 2 * W * C1p * xbytes              # manual x window double buffer
           + 4 * C2p * 4 * 2                   # gamma / beta
           + tl * (K * C1p + C2p) * 4)         # im2col slab + f32 accumulator
    vmem_limit = int(min(max(est + 8 * 1024 * 1024, 24 * 1024 * 1024),
                         64 * 1024 * 1024))

    kernel = functools.partial(_conv_ln_relu_kernel, K=K, d=d, c2=C2)

    out = pl.pallas_call(
        kernel,
        out_shape=jax.ShapeDtypeStruct((B, L_pad, C2p), out_dtype),
        grid=(B, n_l),
        in_specs=[
            pl.BlockSpec(memory_space=pl.ANY),                       # x stays in HBM
            pl.BlockSpec((K * C1p, C2p), lambda b, j: (0, 0)),       # weights resident
            pl.BlockSpec((1, C2p), lambda b, j: (0, 0)),             # LN gamma
            pl.BlockSpec((1, C2p), lambda b, j: (0, 0)),             # LN beta
        ],
        out_specs=pl.BlockSpec((None, tl, C2p), lambda b, j: (b, j, 0)),
        scratch_shapes=[
            pltpu.VMEM((2, W, C1p), x.dtype),      # double-buffered input windows
            pltpu.SemaphoreType.DMA((2,)),
        ],
        compiler_params=pltpu.CompilerParams(
            # j ("arbitrary") carries the manual prefetch chain in-order on one
            # core; B ("parallel") is split across TensorCores on v7x.
            # TODO(synk): when B == 1, v7x's second core idles; would need a
            #             core-splittable axis without the cross-step DMA carry.
            dimension_semantics=("parallel", "arbitrary"),
            vmem_limit_bytes=vmem_limit,
        ),
    )(xp, w2, gamma2, beta2)

    if L_pad != L or C2p != C2:
        out = out[:, :L, :C2]
    return out


def _reference(x, weight_oik, gamma, beta, *, k, s, p, d):
    """Pure-JAX reference mirroring the PyTorch forward."""
    pad = autopad(k, p, d)
    xt = jnp.transpose(x, (0, 2, 1))  # (B, C1, L)
    y = jax.lax.conv_general_dilated(
        xt, weight_oik, window_strides=(s,), padding=[(pad, pad)],
        rhs_dilation=(d,), dimension_numbers=("NCH", "OIH", "NCH"))
    y = jnp.transpose(y, (0, 2, 1))  # (B, L_out, C2)
    mean = y.mean(-1, keepdims=True)
    var = ((y - mean) ** 2).mean(-1, keepdims=True)
    yn = (y - mean) / jnp.sqrt(var + 1e-5) * gamma + beta
    return jnp.maximum(yn, 0.0)


if __name__ == "__main__":
    B, L, C1, C2, K, S, D = 2, 16, 4, 8, 3, 1, 1

    key = jax.random.PRNGKey(0)
    kx, kw, kg, kb = jax.random.split(key, 4)
    x = jax.random.normal(kx, (B, L, C1), dtype=jnp.float32)
    # torch Conv1d layout: (C_out, C_in, K), bias=False.
    weight = jax.random.normal(kw, (C2, C1, K), dtype=jnp.float32) * 0.1
    gamma = 1.0 + 0.1 * jax.random.normal(kg, (C2,), dtype=jnp.float32)
    beta = 0.1 * jax.random.normal(kb, (C2,), dtype=jnp.float32)

    ref = _reference(x, weight, gamma, beta, k=K, s=S, p=None, d=D)

    # f32, default tile (single L tile at this toy size).
    out = jax.block_until_ready(
        conv1d_block(x, weight, gamma, beta, k=K, s=S, p=None, d=D))
    assert out.shape == ref.shape == (B, L, C2), (out.shape, ref.shape)
    assert jnp.allclose(out, ref, atol=1e-4, rtol=1e-4), float(jnp.abs(out - ref).max())

    # f32, forced multi-tile path (exercises the double-buffered window prefetch).
    out_t = jax.block_until_ready(
        conv1d_block(x, weight, gamma, beta, k=K, s=S, p=None, d=D, tl=8))
    assert jnp.allclose(out_t, ref, atol=1e-4, rtol=1e-4), float(jnp.abs(out_t - ref).max())

    # bf16 activations/weights (f32 accumulation + LN inside the kernel).
    out_bf = jax.block_until_ready(conv1d_block(
        x.astype(jnp.bfloat16), weight.astype(jnp.bfloat16), gamma, beta,
        k=K, s=S, p=None, d=D, out_dtype=jnp.float32))
    assert jnp.allclose(out_bf, ref, atol=1e-1, rtol=1e-1), float(jnp.abs(out_bf - ref).max())

    print("KERNEL_OK")
</pallas_src>

<mosaic_0001>
module attributes {stable_mosaic.version = 11 : i64} {
  func.func @_conv_ln_relu_kernel(%arg0: i32, %arg1: i32, %arg2: memref<2x18x128xf32, #tpu.memory_space<any>>, %arg3: memref<384x128xf32, #tpu.memory_space<vmem>>, %arg4: memref<1x128xf32, #tpu.memory_space<vmem>>, %arg5: memref<1x128xf32, #tpu.memory_space<vmem>>, %arg6: memref<1x16x128xf32, #tpu.memory_space<vmem>>, %arg7: memref<2x18x128xf32, #tpu.memory_space<vmem>>, %arg8: memref<2x!tpu.dma_semaphore, #tpu.memory_space<semaphore_mem>>) attributes {dimension_semantics = [#tpu.dimension_semantics<parallel>, #tpu.dimension_semantics<arbitrary>], iteration_bounds = array<i64: 2, 1>, scalar_prefetch = 0 : i64, scratch_operands = 2 : i64, tpu.core_type = #tpu.core_type<tc>, window_params = [{}, {pipeline_mode = #tpu.pipeline_mode<synchronous>, transform_indices = @transform_1, window_bounds = array<i64: 384, 128>}, {pipeline_mode = #tpu.pipeline_mode<synchronous>, transform_indices = @transform_2, window_bounds = array<i64: 1, 128>}, {pipeline_mode = #tpu.pipeline_mode<synchronous>, transform_indices = @transform_3, window_bounds = array<i64: 1, 128>}, {transform_indices = @transform_4, window_bounds = array<i64: 1, 16, 128>}]} {
    %c2_i32 = arith.constant 2 : i32
    %c0_i32 = arith.constant 0 : i32
    %0 = arith.cmpi eq, %c2_i32, %c0_i32 : i32
    %c1_i32 = arith.constant 1 : i32
    %1 = arith.select %0, %c1_i32, %c2_i32 : i32
    %2 = arith.remsi %arg1, %1 : i32
    %c0_i32_0 = arith.constant 0 : i32
    %3 = arith.cmpi ne, %2, %c0_i32_0 : i32
    %c0_i32_1 = arith.constant 0 : i32
    %4 = arith.cmpi slt, %2, %c0_i32_1 : i32
    %c0_i32_2 = arith.constant 0 : i32
    %5 = arith.cmpi slt, %1, %c0_i32_2 : i32
    %6 = arith.xori %4, %5 : i1
    %7 = arith.andi %6, %3 : i1
    %8 = arith.addi %2, %1 : i32
    %9 = arith.select %7, %8, %2 : i32
    %c0_i32_3 = arith.constant 0 : i32
    %10 = arith.cmpi eq, %arg1, %c0_i32_3 : i32
    %11 = arith.extui %10 : i1 to i32
    %c0_i32_4 = arith.constant 0 : i32
    %12 = arith.cmpi ne, %11, %c0_i32_4 : i32
    scf.if %12 {
      %c0_i32_30 = arith.constant 0 : i32
      %68 = tpu.assume_multiple %c0_i32_30, 16 : i32
      %c0_i32_31 = arith.constant 0 : i32
      %c0_i32_32 = arith.constant 0 : i32
      %c0_i32_33 = arith.constant 0 : i32
      %69 = tpu.memref_slice %arg2[%arg0, %68, %c0_i32_33] : memref<2x18x128xf32, #tpu.memory_space<any>> -> memref<1x18x128xf32, #tpu.memory_space<any>>
      %70 = tpu.memref_squeeze %69 : memref<1x18x128xf32, #tpu.memory_space<any>> -> memref<18x128xf32, #tpu.memory_space<any>>
      %c0_i32_34 = arith.constant 0 : i32
      %c0_i32_35 = arith.constant 0 : i32
      %71 = tpu.memref_slice %arg7[%c0_i32_31, %c0_i32_34, %c0_i32_35] : memref<2x18x128xf32, #tpu.memory_space<vmem>> -> memref<1x18x128xf32, #tpu.memory_space<vmem>>
      %72 = tpu.memref_squeeze %71 : memref<1x18x128xf32, #tpu.memory_space<vmem>> -> memref<18x128xf32, #tpu.memory_space<vmem>>
      %73 = tpu.memref_slice %arg8[%c0_i32_32] : memref<2x!tpu.dma_semaphore, #tpu.memory_space<semaphore_mem>> -> memref<1x!tpu.dma_semaphore, #tpu.memory_space<semaphore_mem>>
      %74 = tpu.memref_squeeze %73 : memref<1x!tpu.dma_semaphore, #tpu.memory_space<semaphore_mem>> -> memref<!tpu.dma_semaphore, #tpu.memory_space<semaphore_mem>>
      tpu.enqueue_dma source(%70 : memref<18x128xf32, #tpu.memory_space<any>>) target(%72 : memref<18x128xf32, #tpu.memory_space<vmem>>) target_semaphore(%74 : memref<!tpu.dma_semaphore, #tpu.memory_space<semaphore_mem>>)
    } else {
    }
    %c1_i32_5 = arith.constant 1 : i32
    %13 = arith.addi %arg1, %c1_i32_5 : i32
    %c1_i32_6 = arith.constant 1 : i32
    %14 = arith.cmpi slt, %13, %c1_i32_6 : i32
    %15 = arith.extui %14 : i1 to i32
    %c0_i32_7 = arith.constant 0 : i32
    %16 = arith.cmpi ne, %15, %c0_i32_7 : i32
    scf.if %16 {
      %c1_i32_30 = arith.constant 1 : i32
      %68 = arith.addi %arg1, %c1_i32_30 : i32
      %c1_i32_31 = arith.constant 1 : i32
      %69 = arith.subi %c1_i32_31, %9 : i32
      %c16_i32_32 = arith.constant 16 : i32
      %70 = arith.muli %68, %c16_i32_32 : i32
      %71 = tpu.assume_multiple %70, 16 : i32
      %c0_i32_33 = arith.constant 0 : i32
      %72 = tpu.memref_slice %arg2[%arg0, %71, %c0_i32_33] : memref<2x18x128xf32, #tpu.memory_space<any>> -> memref<1x18x128xf32, #tpu.memory_space<any>>
      %73 = tpu.memref_squeeze %72 : memref<1x18x128xf32, #tpu.memory_space<any>> -> memref<18x128xf32, #tpu.memory_space<any>>
      %c0_i32_34 = arith.constant 0 : i32
      %c0_i32_35 = arith.constant 0 : i32
      %74 = tpu.memref_slice %arg7[%69, %c0_i32_34, %c0_i32_35] : memref<2x18x128xf32, #tpu.memory_space<vmem>> -> memref<1x18x128xf32, #tpu.memory_space<vmem>>
      %75 = tpu.memref_squeeze %74 : memref<1x18x128xf32, #tpu.memory_space<vmem>> -> memref<18x128xf32, #tpu.memory_space<vmem>>
      %76 = tpu.memref_slice %arg8[%69] : memref<2x!tpu.dma_semaphore, #tpu.memory_space<semaphore_mem>> -> memref<1x!tpu.dma_semaphore, #tpu.memory_space<semaphore_mem>>
      %77 = tpu.memref_squeeze %76 : memref<1x!tpu.dma_semaphore, #tpu.memory_space<semaphore_mem>> -> memref<!tpu.dma_semaphore, #tpu.memory_space<semaphore_mem>>
      tpu.enqueue_dma source(%73 : memref<18x128xf32, #tpu.memory_space<any>>) target(%75 : memref<18x128xf32, #tpu.memory_space<vmem>>) target_semaphore(%77 : memref<!tpu.dma_semaphore, #tpu.memory_space<semaphore_mem>>)
    } else {
    }
    %c16_i32 = arith.constant 16 : i32
    %17 = arith.muli %arg1, %c16_i32 : i32
    %18 = tpu.assume_multiple %17, 16 : i32
    %c0_i32_8 = arith.constant 0 : i32
    %19 = tpu.memref_slice %arg2[%arg0, %18, %c0_i32_8] : memref<2x18x128xf32, #tpu.memory_space<any>> -> memref<1x18x128xf32, #tpu.memory_space<any>>
    %20 = tpu.memref_squeeze %19 : memref<1x18x128xf32, #tpu.memory_space<any>> -> memref<18x128xf32, #tpu.memory_space<any>>
    %c0_i32_9 = arith.constant 0 : i32
    %c0_i32_10 = arith.constant 0 : i32
    %21 = tpu.memref_slice %arg7[%9, %c0_i32_9, %c0_i32_10] : memref<2x18x128xf32, #tpu.memory_space<vmem>> -> memref<1x18x128xf32, #tpu.memory_space<vmem>>
    %22 = tpu.memref_squeeze %21 : memref<1x18x128xf32, #tpu.memory_space<vmem>> -> memref<18x128xf32, #tpu.memory_space<vmem>>
    %23 = tpu.memref_slice %arg8[%9] : memref<2x!tpu.dma_semaphore, #tpu.memory_space<semaphore_mem>> -> memref<1x!tpu.dma_semaphore, #tpu.memory_space<semaphore_mem>>
    %24 = tpu.memref_squeeze %23 : memref<1x!tpu.dma_semaphore, #tpu.memory_space<semaphore_mem>> -> memref<!tpu.dma_semaphore, #tpu.memory_space<semaphore_mem>>
    tpu.wait_dma2 semaphore(%24 : memref<!tpu.dma_semaphore, #tpu.memory_space<semaphore_mem>>) src(%20 : memref<18x128xf32, #tpu.memory_space<any>>) dst(%22 : memref<18x128xf32, #tpu.memory_space<vmem>>)
    %25 = arith.index_cast %9 : i32 to index
    %c0 = arith.constant 0 : index
    %c0_11 = arith.constant 0 : index
    %26 = vector.load %arg7[%25, %c0, %c0_11] : memref<2x18x128xf32, #tpu.memory_space<vmem>>, vector<1x16x128xf32>
    %27 = vector.shape_cast %26 : vector<1x16x128xf32> to vector<16x128xf32>
    %28 = arith.index_cast %9 : i32 to index
    %c1 = arith.constant 1 : index
    %c0_12 = arith.constant 0 : index
    %29 = vector.load %arg7[%28, %c1, %c0_12] : memref<2x18x128xf32, #tpu.memory_space<vmem>>, vector<1x16x128xf32>
    %30 = vector.shape_cast %29 : vector<1x16x128xf32> to vector<16x128xf32>
    %31 = arith.index_cast %9 : i32 to index
    %c2 = arith.constant 2 : index
    %c0_13 = arith.constant 0 : index
    %32 = vector.load %arg7[%31, %c2, %c0_13] : memref<2x18x128xf32, #tpu.memory_space<vmem>>, vector<1x16x128xf32>
    %33 = vector.shape_cast %32 : vector<1x16x128xf32> to vector<16x128xf32>
    %34 = tpu.concatenate %27, %30, %33 in 1 : vector<16x128xf32>, vector<16x128xf32>, vector<16x128xf32> -> vector<16x384xf32>
    %c0_14 = arith.constant 0 : index
    %c0_15 = arith.constant 0 : index
    %35 = vector.load %arg3[%c0_14, %c0_15] : memref<384x128xf32, #tpu.memory_space<vmem>>, vector<384x128xf32>
    %cst = arith.constant dense<0.000000e+00> : vector<16x128xf32>
    %36 = tpu.matmul %34, %35, %cst {dimension_numbers = #tpu.dot_dimension_numbers<[1], [0], [0], [1], [0, 0, 1, 1], [], []>} : vector<16x384xf32>, vector<384x128xf32>, vector<16x128xf32> -> vector<16x128xf32>
    %cst_16 = arith.constant dense<0.000000e+00> : vector<16xf32>
    %37 = vector.multi_reduction <add>, %36, %cst_16 [1] : vector<16x128xf32> to vector<16xf32>
    %38 = vector.shape_cast %37 : vector<16xf32> to vector<16x1xf32>
    %cst_17 = arith.constant 1.250000e-01 : f32
    %39 = vector.broadcast %cst_17 : f32 to vector<16x1xf32>
    %40 = arith.mulf %38, %39 : vector<16x1xf32>
    %41 = arith.mulf %36, %36 : vector<16x128xf32>
    %cst_18 = arith.constant dense<0.000000e+00> : vector<16xf32>
    %42 = vector.multi_reduction <add>, %41, %cst_18 [1] : vector<16x128xf32> to vector<16xf32>
    %43 = vector.shape_cast %42 : vector<16xf32> to vector<16x1xf32>
    %cst_19 = arith.constant 1.250000e-01 : f32
    %44 = vector.broadcast %cst_19 : f32 to vector<16x1xf32>
    %45 = arith.mulf %43, %44 : vector<16x1xf32>
    %46 = arith.mulf %40, %40 : vector<16x1xf32>
    %47 = arith.subf %45, %46 : vector<16x1xf32>
    %cst_20 = arith.constant 0.000000e+00 : f32
    %48 = vector.broadcast %cst_20 : f32 to vector<16x1xf32>
    %49 = arith.maximumf %47, %48 : vector<16x1xf32>
    %50 = vector.broadcast %40 : vector<16x1xf32> to vector<16x128xf32>
    %51 = arith.subf %36, %50 : vector<16x128xf32>
    %cst_21 = arith.constant 9.99999974E-6 : f32
    %52 = vector.broadcast %cst_21 : f32 to vector<16x1xf32>
    %53 = arith.addf %49, %52 : vector<16x1xf32>
    %54 = math.rsqrt %53 : vector<16x1xf32>
    %55 = vector.broadcast %54 : vector<16x1xf32> to vector<16x128xf32>
    %56 = arith.mulf %51, %55 : vector<16x128xf32>
    %c0_22 = arith.constant 0 : index
    %c0_23 = arith.constant 0 : index
    %57 = vector.load %arg4[%c0_22, %c0_23] : memref<1x128xf32, #tpu.memory_space<vmem>>, vector<1x128xf32>
    %58 = vector.broadcast %57 : vector<1x128xf32> to vector<16x128xf32>
    %59 = arith.mulf %56, %58 : vector<16x128xf32>
    %c0_24 = arith.constant 0 : index
    %c0_25 = arith.constant 0 : index
    %60 = vector.load %arg5[%c0_24, %c0_25] : memref<1x128xf32, #tpu.memory_space<vmem>>, vector<1x128xf32>
    %61 = vector.broadcast %60 : vector<1x128xf32> to vector<16x128xf32>
    %62 = arith.addf %59, %61 : vector<16x128xf32>
    %cst_26 = arith.constant 0.000000e+00 : f32
    %63 = vector.broadcast %cst_26 : f32 to vector<16x128xf32>
    %64 = arith.maximumf %62, %63 : vector<16x128xf32>
    %c0_27 = arith.constant 0 : index
    %c0_28 = arith.constant 0 : index
    %c0_29 = arith.constant 0 : index
    %65 = vector.load %arg6[%c0_27, %c0_28, %c0_29] : memref<1x16x128xf32, #tpu.memory_space<vmem>>, vector<1x16x128xf32>
    %66 = vector.shape_cast %65 : vector<1x16x128xf32> to vector<16x128xf32>
    %67 = vector.shape_cast %64 : vector<16x128xf32> to vector<1x16x128xf32>
    tpu.vector_store %arg6[%c0_27, %c0_28, %c0_29], %67 {strides = array<i32>} : memref<1x16x128xf32, #tpu.memory_space<vmem>>, vector<1x16x128xf32>,
    return
  }
  func.func @transform_1(%arg0: i32, %arg1: i32) -> (i32, i32) {
    %c0_i32 = arith.constant 0 : i32
    %c0_i32_0 = arith.constant 0 : i32
    %c0_i32_1 = arith.constant 0 : i32
    return %c0_i32, %c0_i32_0 : i32, i32
  }
  func.func @transform_2(%arg0: i32, %arg1: i32) -> (i32, i32) {
    %c0_i32 = arith.constant 0 : i32
    %c0_i32_0 = arith.constant 0 : i32
    %c0_i32_1 = arith.constant 0 : i32
    return %c0_i32, %c0_i32_0 : i32, i32
  }
  func.func @transform_3(%arg0: i32, %arg1: i32) -> (i32, i32) {
    %c0_i32 = arith.constant 0 : i32
    %c0_i32_0 = arith.constant 0 : i32
    %c0_i32_1 = arith.constant 0 : i32
    return %c0_i32, %c0_i32_0 : i32, i32
  }
  func.func @transform_4(%arg0: i32, %arg1: i32) -> (i32, i32, i32) {
    %c0_i32 = arith.constant 0 : i32
    %c0_i32_0 = arith.constant 0 : i32
    return %arg0, %arg1, %c0_i32 : i32, i32, i32
  }
}

</mosaic_0001>

<bundles_post_ra>
// kernel: tpu_custom_call.1
= control target key start
LH: loop header
LB: loop body
LE: loop exit
PB: predicated region body
PF: predicated region fallthrough
CT: control target
= control target key end

     0   :  { %9 = vsyncpa [#allocation5], 0  ;;  %s1216_s0 = inlined_call_operand.vmem [shape: f32[2,18,128], index: 0, kind: input, shape index: {}]   ;;  %s1217_s1 = inlined_call_operand.hbm [shape: f32[384,128], index: 1, kind: input, shape index: {}]   ;;  %s1218_s2 = inlined_call_operand.vmem [shape: f32[1,128], index: 2, kind: input, shape index: {}]   ;;  %s1219_s3 = inlined_call_operand.vmem [shape: f32[1,128], index: 3, kind: input, shape index: {}]   ;;  %s1220_s4 = inlined_call_operand.hbm [shape: f32[2,16,128], index: 4, kind: output, shape index: {}]  }
   0x1   :  { %10 = vsyncpa [#allocation6], 0 }
   0x2   :  { %12 = vsyncpa [#allocation6 + $0x1], 0  ;;  %s1067_s15 = smov 0   ;;  %s1069_s16 = smov 0  }
   0x3   :  { %s1071_s17 = smov 0   ;;  %s1073_s18 = smov 0  }
   0x4   :  { %s1075_s19 = smov 0   ;;  %s1077_s20 = smov 0  }
   0x5 LB: > { %s733_s21 = sadd.s32 4294967295, %s1034_s20   ;;  %s734_s22 = sadd.s32 4294967294, %s1034_s20   ;;  %s1034_s20 = sphi %s1077_s20, %s18_s20   ;;  %s1030_s19 = sphi %s1075_s19, %s1229_s19   ;;  %s1026_s18 = sphi %s1073_s18, %s1228_s18   ;;  %s1022_s17 = sphi %s1071_s17, %s1227_s17   ;;  %s1018_s16 = sphi %s1069_s16, %s1226_s16   ;;  %s1014_s15 = sphi %s1067_s15, %s1225_s15  }
   0x6   : > { %s30_s23 = sadd.s32 1, %s1030_s19  ;;  %s102_s24 = sadd.s32 1, %s1022_s17 }
   0x7   : > { %p32_p0 = scmp.ge.s32.totalorder %s30_s23, 2  ;;  %p112_p1 = scmp.ne.s32.totalorder %s1022_s17, %s1018_s16 }
   0x8   : > { %p113_p2 = scmp.eq.s32.totalorder %s733_s21, 1  ;;  %p118_p3 = scmp.ne.s32.totalorder %s1018_s16, %s1014_s15 }
   0x9   : > { %s1231_s23 = smov (%p32_p0, %s30_s23), 0  ;;  %p119_p5 = scmp.eq.s32.totalorder %s734_s22, 1 }
   0xa   : > { %p1107_p4 = por %p113_p2, %p112_p1  ;;  %s97_s26 = ssub.s32 %s1030_s19, %s1231_s23 }
   0xb   : > { %p735_p6 = scmp.ge.s32.totalorder %s1034_s20, 1  ;;  %p100_p7 = scmp.eq.s32.totalorder %s97_s26, 0 }
   0xc   : > { %p1114_p8 = por %p119_p5, %p118_p3  ;;  %p126_p9 = scmp.lt.s32.totalorder %s1034_s20, 3 }
   0xd   : > { %s1120_s28 = scalar_select %p100_p7, %s1022_s17, %s102_s24  }
   0xe   : > { %p1122_p10 = pnand %p735_p6, %p126_p9  ;;  %p1126_p11 = scmp.eq.s32.totalorder %s733_s21, 0 }
   0xf   : > { %s1036_s5 = smov [#allocation4]  }
  0x10   : > { %p858_p12 = pneg %p1122_p10  ;;  %s138_s6 = sshll.u32 %s1036_s5, 4  ;;  %s139_s6 = int_to_ptr.vmem [resolvable:$true] %s138_s6 }
  0x11   : > { %s937_s7 = scalar_lea.vmem %s139_s6, 6144  ;;  %p945_p5 = scmp.lt.s32.totalorder %s139_s6, %s139_s6 }
  0x12   : > { %p859_p13 = pnand %p1126_p11, %p858_p12  ;;  %p938_p1 = scmp.ne.s32.totalorder %s139_s6, %s937_s7 }
  0x13   : > { %p946_p6 = scmp.lt.s32.totalorder %s937_s7, %s937_s7 }
  0x14   : > { %p928_p0 = pneg %p859_p13 }
  0x15   : > { %p947_p7 = por %p946_p6, %p945_p5 }
  0x16   : > { %p940_p2 = pnand %p938_p1, %p928_p0 }
  0x18   : > { %p941_p3 = pneg %p940_p2 }
  0x1a   : > { %p948_p9 = pnand %p947_p7, %p941_p3 }
  0x1c   : > { %951 = shalt.err (!%p948_p9)
}
  0x1d   : > { %s1037_s8 = smov 128   ;;  %s1038_s9 = smov 8  }
  0x1e   : > { %861 = dma.hbm_to_vmem [thread:$0]  (!%p859_p13), %s1217_s1, 6144, %s139_s6, [#allocation5], %s1037_s8, %s1037_s8, %s1038_s9  }
  0x1f   : > { %160 = sbr.rel (%p1122_p10) target bundleno = 467 (0x1d3), region = 32 }
  0x24   : > { %1003 = dma.done.wait (%p1126_p11), [#allocation5], 6144  }
  0x25   : > { %1005 = vsyncadd (%p1126_p11), [#allocation5], 4294961152  ;;  %s176_s12 = sand.u32 1, %s1018_s16   ;;  %s196_s13 = smul.u32 24, %s1026_s18 }
  0x26   : > { %s739_s14 = sshll.u32 %s176_s12, 4 }
  0x27   : > { %s198_s24 = scalar_lea.vmem %s1216_s0, %s196_s13  ;;  %s1150_s26 = scalar_lea.vmem [#allocation7], %s739_s14 }
  0x28   : > { %v237_v0 = vld [vmem:[%s198_s24] sm:$0xff]  ;;  %v239_v1 = vld [vmem:[%s198_s24 + $0x8] sm:$0xff]  ;;  %v740_v2 = vld [vmem:[%s198_s24 + $0x10] sm:$0x3] }
  0x29   : > { %238 = vst [vmem:[#allocation2] sm:$0xff] %v237_v0  ;;  %240 = vst [vmem:[#allocation2 + $0x8] sm:$0xff] %v239_v1 }
  0x2a   : > { %252 = vst [vmem:[#allocation2 + $0x10] sm:$0x3] %v740_v2 }
  0x2b   : > { %256 = vsyncadd [#allocation3], 288 }
  0x2c   : > { %1006 = dma.done.wait [#allocation3], 288 }
  0x2d   : > { %1007 = vsyncadd [#allocation3], 4294967008  ;;  %v372_v3 = vld [vmem:[#allocation4 + $0xf8] sm:$0xff]  ;;  %v371_v6 = vld [vmem:[#allocation4 + $0xf0] sm:$0xff]  ;;  %s760_s7 = sshll.u32 %s1026_s18, 8  ;;  %s605_s8 = sshll.u32 %s1150_s26, 4  ;;  %s1166_s8 = int_to_ptr.vmem [resolvable:$true] %s605_s8 }
  0x2e   : > { %v388_v4 = vld [vmem:[#allocation4 + $0x178] sm:$0xff]  ;;  %761 = vmatprep.subr.mxu0 %v372_v3  ;;  %v387_v7 = vld [vmem:[#allocation4 + $0x170] sm:$0xff]  ;;  %v370_v9 = vld [vmem:[#allocation4 + $0xe8] sm:$0xff]  ;;  %s1164_s11 = scalar_lea.hbm %s1220_s4, %s760_s7  ;;  %s1171_s13 = scalar_lea.sflag [#allocation6], %s176_s12 }
  0x2f   : > { %v356_v5 = vld [vmem:[#allocation4 + $0x78] sm:$0xff]  ;;  %817 = vmatprep.subr.mxu1 %v388_v4  ;;  %v355_v8 = vld [vmem:[#allocation4 + $0x70] sm:$0xff]  ;;  %v386_v10 = vld [vmem:[#allocation4 + $0x168] sm:$0xff]  ;;  %s952_s14 = scalar_lea.vmem %s1166_s8, 256  ;;  %s1039_s18 = smov [#allocation7]  }
  0x30   : > { %762 = vmatpush3.msra.mxu0 %v356_v5  ;;  %818 = vmatpush3.msra.mxu1 %v388_v4  ;;  %v354_v11 = vld [vmem:[#allocation4 + $0x68] sm:$0xff]  ;;  %v369_v12 = vld [vmem:[#allocation4 + $0xe0] sm:$0xff]  ;;  %v368_v15 = vld [vmem:[#allocation4 + $0xd8] sm:$0xff]  ;;  %p953_p10 = scmp.ne.s32.totalorder %s1166_s8, %s952_s14  ;;  %s956_s21 = sshll.u32 %s1039_s18, 4  ;;  %s957_s21 = int_to_ptr.vmem [resolvable:$false] %s956_s21 }
  0x31   : > { %763 = vmatprep.subr.mxu0 %v371_v6  ;;  %819 = vmatprep.subr.mxu1 %v387_v7  ;;  %v385_v13 = vld [vmem:[#allocation4 + $0x160] sm:$0xff]  ;;  %v384_v16 = vld [vmem:[#allocation4 + $0x158] sm:$0xff]  ;;  %v367_v18 = vld [vmem:[#allocation4 + $0xd0] sm:$0xff]  ;;  %s958_s22 = scalar_lea.vmem %s957_s21, 512  ;;  %p959_p13 = scmp.lt.s32.totalorder %s1166_s8, %s957_s21 }
  0x32   : > { %764 = vmatpush3.msra.mxu0 %v355_v8  ;;  %820 = vmatpush3.msra.mxu1 %v387_v7  ;;  %v353_v14 = vld [vmem:[#allocation4 + $0x60] sm:$0xff]  ;;  %v352_v17 = vld [vmem:[#allocation4 + $0x58] sm:$0xff]  ;;  %v383_v19 = vld [vmem:[#allocation4 + $0x150] sm:$0xff]  ;;  %p954_p11 = pnand %p953_p10, %p1107_p4  ;;  %p960_p0 = scmp.lt.s32.totalorder %s958_s22, %s952_s14 }
  0x33   : > { %765 = vmatprep.subr.mxu0 %v370_v9  ;;  %821 = vmatprep.subr.mxu1 %v386_v10  ;;  %v351_v20 = vld [vmem:[#allocation4 + $0x50] sm:$0xff]  ;;  %v366_v21 = vld [vmem:[#allocation4 + $0xc8] sm:$0xff]  ;;  %v365_v24 = vld [vmem:[#allocation4 + $0xc0] sm:$0xff] }
  0x34   : > { %766 = vmatpush3.msra.mxu0 %v354_v11  ;;  %822 = vmatpush3.msra.mxu1 %v386_v10  ;;  %v382_v22 = vld [vmem:[#allocation4 + $0x148] sm:$0xff]  ;;  %v381_v25 = vld [vmem:[#allocation4 + $0x140] sm:$0xff]  ;;  %v364_v27 = vld [vmem:[#allocation4 + $0xb8] sm:$0xff]  ;;  %p955_p12 = pneg %p954_p11  ;;  %p961_p1 = por %p960_p0, %p959_p13 }
  0x35   : > { %767 = vmatprep.subr.mxu0 %v369_v12  ;;  %823 = vmatprep.subr.mxu1 %v385_v13  ;;  %v350_v23 = vld [vmem:[#allocation4 + $0x48] sm:$0xff]  ;;  %v349_v26 = vld [vmem:[#allocation4 + $0x40] sm:$0xff]  ;;  %v380_v28 = vld [vmem:[#allocation4 + $0x138] sm:$0xff] }
  0x36   : > { %768 = vmatpush3.msra.mxu0 %v353_v14  ;;  %824 = vmatpush3.msra.mxu1 %v385_v13  ;;  %v348_v29 = vld [vmem:[#allocation4 + $0x38] sm:$0xff]  ;;  %v363_v30 = vld [vmem:[#allocation4 + $0xb0] sm:$0xff]  ;;  %v362_v33 = vld [vmem:[#allocation4 + $0xa8] sm:$0xff]  ;;  %p962_p2 = pnand %p961_p1, %p955_p12 }
  0x37   : > { %769 = vmatprep.subr.mxu0 %v368_v15  ;;  %825 = vmatprep.subr.mxu1 %v384_v16  ;;  %v379_v31 = vld [vmem:[#allocation4 + $0x130] sm:$0xff]  ;;  %v378_v34 = vld [vmem:[#allocation4 + $0x128] sm:$0xff]  ;;  %v361_v36 = vld [vmem:[#allocation4 + $0xa0] sm:$0xff] }
  0x38   : > { %770 = vmatpush3.msra.mxu0 %v352_v17  ;;  %826 = vmatpush3.msra.mxu1 %v384_v16  ;;  %v347_v32 = vld [vmem:[#allocation4 + $0x30] sm:$0xff]  ;;  %v346_v35 = vld [vmem:[#allocation4 + $0x28] sm:$0xff]  ;;  %v377_v37 = vld [vmem:[#allocation4 + $0x120] sm:$0xff] }
  0x39   : > { %771 = vmatprep.subr.mxu0 %v367_v18  ;;  %827 = vmatprep.subr.mxu1 %v383_v19  ;;  %v345_v38 = vld [vmem:[#allocation4 + $0x20] sm:$0xff]  ;;  %v360_v39 = vld [vmem:[#allocation4 + $0x98] sm:$0xff]  ;;  %v359_v42 = vld [vmem:[#allocation4 + $0x90] sm:$0xff] }
  0x3a   : > { %772 = vmatpush3.msra.mxu0 %v351_v20  ;;  %828 = vmatpush3.msra.mxu1 %v383_v19  ;;  %v376_v40 = vld [vmem:[#allocation4 + $0x118] sm:$0xff]  ;;  %v375_v43 = vld [vmem:[#allocation4 + $0x110] sm:$0xff]  ;;  %v358_v45 = vld [vmem:[#allocation4 + $0x88] sm:$0xff] }
  0x3b   : > { %773 = vmatprep.subr.mxu0 %v366_v21  ;;  %829 = vmatprep.subr.mxu1 %v382_v22  ;;  %v344_v41 = vld [vmem:[#allocation4 + $0x18] sm:$0xff]  ;;  %v343_v44 = vld [vmem:[#allocation4 + $0x10] sm:$0xff]  ;;  %v374_v46 = vld [vmem:[#allocation4 + $0x108] sm:$0xff] }
  0x3c   : > { %774 = vmatpush3.msra.mxu0 %v350_v23  ;;  %830 = vmatpush3.msra.mxu1 %v382_v22  ;;  %v342_v47 = vld [vmem:[#allocation4 + $0x8] sm:$0xff]  ;;  %v357_v48 = vld [vmem:[#allocation4 + $0x80] sm:$0xff]  ;;  %v337_v51 = vld [vmem:[#allocation2 + $0x1] sm:$0xff] }
  0x3d   : > { %775 = vmatprep.subr.mxu0 %v365_v24  ;;  %831 = vmatprep.subr.mxu1 %v381_v25  ;;  %v373_v49 = vld [vmem:[#allocation4 + $0x100] sm:$0xff]  ;;  %v339_v52 = vld [vmem:[#allocation2 + $0x2] sm:$0xff]  ;;  %v751_v23 = vld [vmem:[%s1218_s2] ss:$0 sm:$0xff] }
  0x3e   : > { %776 = vmatpush3.msra.mxu0 %v349_v26  ;;  %832 = vmatpush3.msra.mxu1 %v381_v25  ;;  %v341_v50 = vld [vmem:[#allocation4] sm:$0xff]  ;;  %v335_v53 = vld [vmem:[#allocation2] sm:$0xff]  ;;  %v336_v56 = vld [vmem:[#allocation2 + $0x8] sm:$0xff] }
  0x3f   : > { %777 = vmatprep.subr.mxu0 %v364_v27  ;;  %833 = vmatprep.subr.mxu1 %v380_v28  ;;  %v340_v54 = vld [vmem:[#allocation2 + $0xa] sm:$0xff]  ;;  %v752_v25 = vld [vmem:[%s1219_s3] ss:$0 sm:$0xff] }
  0x40   : > { %778 = vmatpush3.msra.mxu0 %v348_v29  ;;  %834 = vmatpush3.msra.mxu1 %v380_v28  ;;  %v338_v55 = vld [vmem:[#allocation2 + $0x9] sm:$0xff] }
  0x41   : > { %779 = vmatprep.subr.mxu0 %v363_v30  ;;  %835 = vmatprep.subr.mxu1 %v379_v31 }
  0x42   : > { %780 = vmatpush3.msra.mxu0 %v347_v32  ;;  %836 = vmatpush3.msra.mxu1 %v379_v31 }
  0x43   : > { %781 = vmatprep.subr.mxu0 %v362_v33  ;;  %837 = vmatprep.subr.mxu1 %v378_v34 }
  0x44   : > { %782 = vmatpush3.msra.mxu0 %v346_v35  ;;  %838 = vmatpush3.msra.mxu1 %v378_v34 }
  0x45   : > { %783 = vmatprep.subr.mxu0 %v361_v36  ;;  %839 = vmatprep.subr.mxu1 %v377_v37 }
  0x46   : > { %784 = vmatpush3.msra.mxu0 %v345_v38  ;;  %840 = vmatpush3.msra.mxu1 %v377_v37 }
  0x47   : > { %785 = vmatprep.subr.mxu0 %v360_v39  ;;  %841 = vmatprep.subr.mxu1 %v376_v40 }
  0x48   : > { %786 = vmatpush3.msra.mxu0 %v344_v41  ;;  %842 = vmatpush3.msra.mxu1 %v376_v40 }
  0x49   : > { %787 = vmatprep.subr.mxu0 %v359_v42  ;;  %843 = vmatprep.subr.mxu1 %v375_v43 }
  0x4a   : > { %788 = vmatpush3.msra.mxu0 %v343_v44  ;;  %844 = vmatpush3.msra.mxu1 %v375_v43 }
  0x4b   : > { %789 = vmatprep.subr.mxu0 %v358_v45  ;;  %845 = vmatprep.subr.mxu1 %v374_v46 }
  0x4c   : > { %790 = vmatpush3.msra.mxu0 %v342_v47  ;;  %846 = vmatpush3.msra.mxu1 %v374_v46 }
  0x4d   : > { %791 = vmatprep.subr.mxu0 %v357_v48  ;;  %847 = vmatprep.subr.mxu1 %v373_v49 }
  0x4e   : > { %792 = vmatpush3.msra.mxu0 %v341_v50  ;;  %453 = vmatprep.mubr.f32.mxu0 %v337_v51 }
  0x4f   : > { %848 = vmatpush3.msra.mxu1 %v373_v49  ;;  %849 = vmatprep.mubr.f32.mxu1 %v339_v52 }
  0x50   : > { %454 = vmatmul.mubr.f32.vlgmr.msra.gmra.mxu0 %v335_v53  ;;  %850 = vmatmul.mubr.f32.vlgmr.msra.gmra.mxu1 %v340_v54 }
  0x51   : > { %458 = vmatprep.mubr.f32.mxu0 %v338_v55 }
  0x54   : > { %459 = vmatmul.mubr.f32.gmra.mxu0 %v336_v56 }
 0x110   : > { %v793_v57 = vpop.f32.mrf.mxu0  ;;  %v851_v58 = vpop.f32.mrf.mxu1 }
 0x112   : > { %v794_v59 = vpop.f32.mrf.mxu0  ;;  %v530_v61 = vpop.f32.mrf.mxu1 }
 0x113   : > { %v795_v60 = vadd.f32 %v794_v59, %v793_v57 }
 0x114   : > { %v796_v62 = vpop.f32.mrf.mxu0 }
 0x115   : > { %v531_v63 = vadd.f32 %v795_v60, %v530_v61 }
 0x116   : > { %v797_v0 = vpop.f32.mrf.mxu0 }
 0x117   : > { %v798_v1 = vadd.f32 %v797_v0, %v796_v62  ;;  %539 = vadd.xlane.f32.xlu0 %v531_v63  ;;  %v545_v2 = vmul.f32 %v531_v63, %v531_v63 }
 0x119   : > { %v536_v3 = vadd.f32 %v851_v58, %v798_v1  ;;  %547 = vadd.xlane.f32.xlu1 %v545_v2 }
 0x11b   : > { %541 = vadd.xlane.f32.xlu0 %v536_v3  ;;  %v546_v4 = vmul.f32 %v536_v3, %v536_v3 }
 0x11d   : > { %549 = vadd.xlane.f32.xlu1 %v546_v4 }
 0x1a0   : > { %v540_v5 = vpop.xlane.xlu0 %539 }
 0x1a1   : > { %v543_v6 = vmul.f32 0.125, %v540_v5 }
 0x1a2   : > { %v548_v7 = vpop.xlane.xlu1 %547 }
 0x1a3   : > { %v553_v8 = vmul.f32 %v543_v6, %v543_v6  ;;  %v551_v9 = vmul.f32 0.125, %v548_v7  ;;  %v559_v21 = vsub.f32 %v531_v63, %v543_v6 }
 0x1a4   : > { %v542_v10 = vpop.xlane.xlu0 %541 }
 0x1a5   : > { %v555_v11 = vsub.f32 %v551_v9, %v553_v8  ;;  %v544_v12 = vmul.f32 0.125, %v542_v10 }
 0x1a6   : > { %v550_v13 = vpop.xlane.xlu1 %549 }
 0x1a7   : > { %v557_v14 = vmax.f32 %v555_v11, 0.0  ;;  %v554_v15 = vmul.f32 %v544_v12, %v544_v12  ;;  %v552_v16 = vmul.f32 0.125, %v550_v13  ;;  %v560_v26 = vsub.f32 %v536_v3, %v544_v12 }
 0x1a9   : > { %v561_v17 = vadd.f32 1e-05, %v557_v14  ;;  %v556_v18 = vsub.f32 %v552_v16, %v554_v15 }
 0x1ab   : > { %922 = vrsqrt.f32 %v561_v17  ;;  %v558_v19 = vmax.f32 %v556_v18, 0.0 }
 0x1ad   : > { %v562_v20 = vadd.f32 1e-05, %v558_v19 }
 0x1af   : > { %924 = vrsqrt.f32 %v562_v20 }
 0x1b8   : > { %v923_v22 = vpop.eup %922 }
 0x1b9   : > { %v565_v24 = vmul.f32 %v923_v22, %v559_v21 }
 0x1bb   : > { %v574_v27 = vmul.f32 %v751_v23, %v565_v24 }
 0x1bc   : > { %v925_v28 = vpop.eup %924 }
 0x1bd   : > { %v566_v29 = vmul.f32 %v925_v28, %v560_v26  ;;  %v583_v30 = vadd.f32 %v752_v25, %v574_v27 }
 0x1bf   : > { %v575_v31 = vmul.f32 %v751_v23, %v566_v29  ;;  %v585_v32 = vmax.f32 %v583_v30, 0.0 }
 0x1c1   : > { %v584_v33 = vadd.f32 %v752_v25, %v575_v31  ;;  %587 = vst [vmem:[%s1150_s26] sm:$0xff] %v585_v32 }
 0x1c3   : > { %v586_v34 = vmax.f32 %v584_v33, 0.0 }
 0x1c5   : > { %588 = vst [vmem:[%s1150_s26 + $0x8] sm:$0xff] %v586_v34 }
 0x1c6   : > { %965 = shalt.err (!%p962_p2)
}
 0x1c7   : > { %s966_s12 = scalar_lea.hbm %s1164_s11, 256  ;;  %s970_s29 = scalar_lea.hbm %s1220_s4, 512 }
 0x1c8   : > { %p967_p3 = scmp.ne.s32.totalorder %s1164_s11, %s966_s12  ;;  %p971_p7 = scmp.lt.s32.totalorder %s1164_s11, %s1220_s4 }
 0x1c9   : > { %p972_p9 = scmp.lt.s32.totalorder %s970_s29, %s966_s12 }
 0x1ca   : > { %p968_p5 = pnand %p967_p3, %p1107_p4 }
 0x1cb   : > { %p973_p10 = por %p972_p9, %p971_p7 }
 0x1cc   : > { %p969_p6 = pneg %p968_p5 }
 0x1ce   : > { %p974_p11 = pnand %p973_p10, %p969_p6 }
 0x1d0   : > { %977 = shalt.err (!%p974_p11)
}
 0x1d1   : > { %s1040_s6 = smov 128   ;;  %s1041_s7 = smov 8  }
 0x1d2   : > { %856 = dma.vmem_to_hbm [thread:$0]  (%p1107_p4), %s1166_s8, 256, %s1164_s11, %s1171_s13, %s1040_s6, %s1040_s6, %s1041_s7  }
 0x1d3 PF: > { %p868_p12 = scmp.ge.s32.totalorder %s1034_s20, 2  ;;  %s620_s9 = sand.u32 1, %s1014_s15  }
 0x1d4   : > { %s621_s10 = scalar_lea.sflag [#allocation6], %s620_s9 }
 0x1d5   : > { %p863_p13 = pnand %p868_p12, %p1114_p8 }
 0x1d7   : > { %p864_p0 = pneg %p863_p13 }
 0x1d9   : > { %1009 = dma.done.wait (%p864_p0), %s621_s10, 256  }
 0x1da   : > { %1011 = vsyncadd (%p864_p0), %s621_s10, 4294967040  ;;  %s18_s20 = sadd.s32 1, %s1034_s20   ;;  %s1225_s15 = smov %s1018_s16 }
 0x1db   : > { %p15_p1 = scmp.ge.s32.totalorder %s18_s20, 4   ;;  %s1226_s16 = smov %s1022_s17 }
 0x1dc   : > { %s1227_s17 = smov %s1120_s28  ;;  %s1228_s18 = smov %s1030_s19 }
 0x1dd   : > { %s1229_s19 = smov %s1231_s23  ;;  %17 = sbr.rel (!%p15_p1) target bundleno = 5 (0x5), region = 186 }
 0x1e2   :  { %626 = vsyncpa [#allocation5], 1 }
 0x1e3   :  { %628 = vsyncpa [#allocation5 + $0x1], 1 }
 0x1e4   :  { %629 = vsyncpa [#allocation6], 1 }
 0x1e5   :  { %631 = vsyncpa [#allocation6 + $0x1], 1 }
 0x1e6   :  { %632 = vsyncmov [#allocation3] }
 0x1e9   :  { %s633_s25 = vpop.sfrf %632 }
 0x1ea   :  { %p758_p4 = scmp.ne.s32.totalorder %s633_s25, 0 }
 0x1ec   :  { %637 = shalt.err (%p758_p4)  }
 0x1ed   :  { %639 = vsyncmov [#allocation3 + $0x1] }
 0x1f0   :  { %s640_s27 = vpop.sfrf %639 }
 0x1f1   :  { %p759_p8 = scmp.ne.s32.totalorder %s640_s27, 0 }
 0x1f3   :  { %644 = shalt.err (%p759_p8)  }

</bundles_post_ra>
